<compile_context>
chip_gen: v7x
topology: tpu7x:2x2x1
jax: 0.10.0
libtpu: 0.0.40
codegen_flags: <defaults>
</compile_context>

<pallas_src>
import jax
import jax.numpy as jnp
from jax.experimental import pallas as pl
from jax.experimental.pallas import tpu as pltpu


def _round_up(x, m):
    return ((x + m - 1) // m) * m


def _row_tiling(m):
    """Row-tile size: multiple of 8, capped at 256; padded row count."""
    tm = min(256, _round_up(m, 8))
    mp = _round_up(m, tm)
    return tm, mp


# ---------------------------------------------------------------------------
# Kernel 1: fused 1x1 conv (channel Linear):  o = x @ w + b
# ---------------------------------------------------------------------------
def _linear_bias_kernel(x_ref, w_ref, b_ref, o_ref):
    o_ref[...] = (
        jnp.dot(x_ref[...], w_ref[...], preferred_element_type=jnp.float32)
        + b_ref[...]
    ).astype(o_ref.dtype)


def linear_bias(x2d, w, b):
    """(M, K) @ (K, H) + (1, H) -> (M, H); weight/bias stay VMEM-resident."""
    m, k = x2d.shape
    h = w.shape[1]
    tm, mp = _row_tiling(m)
    if mp != m:
        x2d = jnp.pad(x2d, ((0, mp - m), (0, 0)))
    out = pl.pallas_call(
        _linear_bias_kernel,
        out_shape=jax.ShapeDtypeStruct((mp, h), jnp.float32),
        grid_spec=pltpu.PrefetchScalarGridSpec(
            num_scalar_prefetch=0,
            grid=(mp // tm,),
            in_specs=[
                pl.BlockSpec((tm, k), lambda i: (i, 0)),  # stream activations
                pl.BlockSpec((k, h), lambda i: (0, 0)),   # weight resident
                pl.BlockSpec((1, h), lambda i: (0, 0)),   # bias resident
            ],
            out_specs=pl.BlockSpec((tm, h), lambda i: (i, 0)),
        ),
        compiler_params=pltpu.CompilerParams(dimension_semantics=("parallel",)),
    )(x2d, w, b)
    return out[:m]


# ---------------------------------------------------------------------------
# Kernel 2: per-batch l2norm + Gram matrix + relation matmul
#   R[s]  = l2norm(imgD[s]) @ l2norm(imgD[s])^T
#   y[s]  = (R[s] / N) @ g_v[s]
# ---------------------------------------------------------------------------
def _gram_y_kernel(imgd_ref, gv_ref, y_ref, r_ref):
    x = imgd_ref[0]                                         # (S, N, D) f32
    nrm = jnp.sqrt(jnp.sum(x * x, axis=-1, keepdims=True)) + 1e-8
    xn = x / nrm
    r = jnp.einsum("snd,smd->snm", xn, xn,
                   preferred_element_type=jnp.float32)      # (S, N, N)
    r_ref[0] = r.astype(r_ref.dtype)
    inv_n = 1.0 / x.shape[1]
    g = gv_ref[0]                                           # (S, N, Cip)
    y_ref[0] = jnp.einsum("snm,smc->snc", r * inv_n, g,
                          preferred_element_type=jnp.float32).astype(y_ref.dtype)


def gram_and_y(imgd, g_v):
    b0, s, n, d = imgd.shape
    cip = g_v.shape[-1]
    y, r = pl.pallas_call(
        _gram_y_kernel,
        out_shape=(
            jax.ShapeDtypeStruct((b0, s, n, cip), jnp.float32),
            jax.ShapeDtypeStruct((b0, s, n, n), jnp.float32),
        ),
        grid_spec=pltpu.PrefetchScalarGridSpec(
            num_scalar_prefetch=0,
            grid=(b0,),
            in_specs=[
                pl.BlockSpec((1, s, n, d), lambda i: (i, 0, 0, 0)),
                pl.BlockSpec((1, s, n, cip), lambda i: (i, 0, 0, 0)),
            ],
            out_specs=[
                pl.BlockSpec((1, s, n, cip), lambda i: (i, 0, 0, 0)),
                pl.BlockSpec((1, s, n, n), lambda i: (i, 0, 0, 0)),
            ],
        ),
        compiler_params=pltpu.CompilerParams(dimension_semantics=("parallel",)),
    )(imgd, g_v)
    return y, r


# ---------------------------------------------------------------------------
# Kernel 3: fused 1x1 conv (Ci -> C) + BatchNorm affine + residual:
#   o = (x @ w + b) * bn_scale + bn_shift + res
# ---------------------------------------------------------------------------
def _linear_bn_res_kernel(x_ref, w_ref, b_ref, s_ref, t_ref, r_ref, o_ref):
    z = jnp.dot(x_ref[...], w_ref[...], preferred_element_type=jnp.float32) + b_ref[...]
    o_ref[...] = (z * s_ref[...] + t_ref[...] + r_ref[...]).astype(o_ref.dtype)


def linear_bn_residual(x2d, w, b, scale, shift, res2d):
    m, k = x2d.shape
    c = w.shape[1]
    tm, mp = _row_tiling(m)
    if mp != m:
        pad = ((0, mp - m), (0, 0))
        x2d = jnp.pad(x2d, pad)
        res2d = jnp.pad(res2d, pad)
    out = pl.pallas_call(
        _linear_bn_res_kernel,
        out_shape=jax.ShapeDtypeStruct((mp, c), jnp.float32),
        grid_spec=pltpu.PrefetchScalarGridSpec(
            num_scalar_prefetch=0,
            grid=(mp // tm,),
            in_specs=[
                pl.BlockSpec((tm, k), lambda i: (i, 0)),  # stream y rows
                pl.BlockSpec((k, c), lambda i: (0, 0)),   # weight resident
                pl.BlockSpec((1, c), lambda i: (0, 0)),   # bias
                pl.BlockSpec((1, c), lambda i: (0, 0)),   # BN scale
                pl.BlockSpec((1, c), lambda i: (0, 0)),   # BN shift
                pl.BlockSpec((tm, c), lambda i: (i, 0)),  # residual rows
            ],
            out_specs=pl.BlockSpec((tm, c), lambda i: (i, 0)),
        ),
        compiler_params=pltpu.CompilerParams(dimension_semantics=("parallel",)),
    )(x2d, w, b, scale, shift, res2d)
    return out[:m]


# ---------------------------------------------------------------------------
# Module
# ---------------------------------------------------------------------------
class Rs_GCNIPallas:
    """JAX/Pallas equivalent of the PyTorch Rs_GCNI module (bn_layer path)."""

    def __init__(self, in_channels, inter_channels, bn_layer=True, *, key):
        self.in_channels = in_channels
        self.inter_channels = inter_channels
        if self.inter_channels is None:
            self.inter_channels = in_channels // 2
            if self.inter_channels == 0:
                self.inter_channels = 1
        c, ci = self.in_channels, self.inter_channels
        self.cip = _round_up(ci, 128)  # lane-dense padded inter width

        kg_w, kg_b, kw_w, kw_b = jax.random.split(key, 4)

        # g: Conv2d(C -> Ci, 1x1). PyTorch weight (Ci, C, 1, 1); stored (C, Ci)
        # so kernels do x @ w directly; padded columns are zero.
        bound_g = 1.0 / jnp.sqrt(jnp.float32(c))
        wg = jax.random.uniform(kg_w, (c, ci), jnp.float32, -bound_g, bound_g)
        bg = jax.random.uniform(kg_b, (1, ci), jnp.float32, -bound_g, bound_g)
        self.wg = jnp.pad(wg, ((0, 0), (0, self.cip - ci)))
        self.bg = jnp.pad(bg, ((0, 0), (0, self.cip - ci)))

        # W: Conv2d(Ci -> C, 1x1) (+ BatchNorm2d(C) if bn_layer). Stored (Ci, C),
        # padded rows are zero so the padded g_v/y columns contribute nothing.
        bound_w = 1.0 / jnp.sqrt(jnp.float32(ci))
        ww = jax.random.uniform(kw_w, (ci, c), jnp.float32, -bound_w, bound_w)
        bw = jax.random.uniform(kw_b, (1, c), jnp.float32, -bound_w, bound_w)
        if not bn_layer:
            ww = jnp.zeros_like(ww)  # PyTorch zero-inits the conv in this branch
            bw = jnp.zeros_like(bw)
        self.ww = jnp.pad(ww, ((0, self.cip - ci), (0, 0)))
        self.bw = bw

        # BatchNorm2d(C): gamma = beta = 0 (as in the PyTorch init), folded into a
        # per-channel affine with default running stats (mean=0, var=1).
        # TODO(synk): train-mode BN would use batch statistics (needs a cross-row
        # reduction pass); with the module's zero-init gamma/beta the output is
        # identical either way (W_y == 0).
        eps = 1e-5
        if bn_layer:
            gamma = jnp.zeros((1, c), jnp.float32)
            beta = jnp.zeros((1, c), jnp.float32)
            mean = jnp.zeros((1, c), jnp.float32)
            var = jnp.ones((1, c), jnp.float32)
            self.bn_scale = gamma / jnp.sqrt(var + eps)
            self.bn_shift = beta - mean * self.bn_scale
        else:
            self.bn_scale = jnp.ones((1, c), jnp.float32)
            self.bn_shift = jnp.zeros((1, c), jnp.float32)

        # NOTE: self.linearg / self.linearW exist in the PyTorch module but are
        # never used in forward(); they are intentionally omitted.

    def __call__(self, v, imgD, txtD=None):
        b0, s, n, c = v.shape
        assert c == self.in_channels
        assert b0 > 3 and s > 16 and n > 25, \
            "g_f = R[3,16,25,9] requires B0>=4, S>=17, N>=26"
        cip = self.cip
        m = b0 * s * n

        v2d = v.reshape(m, c).astype(jnp.float32)

        # g(v): 1x1 conv over the channel axis (C -> Ci, padded to cip)
        gv2d = linear_bias(v2d, self.wg, self.bg)              # (m, cip)
        g_v = gv2d.reshape(b0, s, n, cip)

        # R = l2norm(imgD) @ l2norm(imgD)^T ; y = (R / N) @ g_v
        y, r = gram_and_y(imgD.astype(jnp.float32), g_v)
        g_f = r[3, 16, 25, 9]

        # W(y): 1x1 conv (Ci -> C) + BN affine + residual add with v
        out2d = linear_bn_residual(y.reshape(m, cip), self.ww, self.bw,
                                   self.bn_scale, self.bn_shift, v2d)
        v_star = out2d.reshape(b0, s, n, c)
        return v_star, g_f


if __name__ == "__main__":
    key = jax.random.PRNGKey(0)
    k_param, k_v, k_img = jax.random.split(key, 3)

    # Small shapes consistent with the forward: the hard-coded g_f = R[3,16,25,9]
    # forces B0 >= 4, S >= 17, N >= 26.
    B0, S, N, C, CI, D_IMG = 4, 17, 32, 128, 64, 64
    v = jax.random.normal(k_v, (B0, S, N, C), jnp.float32)
    imgD = jax.random.normal(k_img, (B0, S, N, D_IMG), jnp.float32)

    mod = Rs_GCNIPallas(C, CI, bn_layer=True, key=k_param)
    v_star, g_f = mod(v, imgD, txtD=None)
    v_star = jax.block_until_ready(v_star)
    g_f = jax.block_until_ready(g_f)

    # ---- plain-JAX reference (same params, same eval-mode BN affine) ----
    with jax.default_matmul_precision("float32"):
        gv_ref = (v.reshape(-1, C) @ mod.wg[:, :CI] + mod.bg[:, :CI]).reshape(B0, S, N, CI)
        nrm = jnp.sqrt(jnp.sum(imgD * imgD, axis=-1, keepdims=True)) + 1e-8
        dn = imgD / nrm
        R_ref = jnp.einsum("bsnd,bsmd->bsnm", dn, dn)
        g_f_ref = R_ref[3, 16, 25, 9]
        y_ref = jnp.einsum("bsnm,bsmc->bsnc", R_ref / N, gv_ref)
        z_ref = y_ref.reshape(-1, CI) @ mod.ww[:CI, :] + mod.bw
        wy_ref = z_ref * mod.bn_scale + mod.bn_shift
        v_star_ref = (wy_ref + v.reshape(-1, C)).reshape(B0, S, N, C)

    assert v_star.shape == (B0, S, N, C)
    assert jnp.allclose(g_f, g_f_ref, atol=2e-3, rtol=1e-3)
    assert jnp.allclose(v_star, v_star_ref, atol=1e-3, rtol=1e-3)
    # With the module's zero-initialized BN gamma/beta, W_y == 0 and v_star == v,
    # exactly matching the freshly-constructed PyTorch module.
    assert jnp.allclose(v_star, v, atol=1e-6)

    # Extra self-check that exercises the full W-path (zero BN gamma would
    # otherwise hide errors in the relation / W-conv kernels).
    mod.bn_scale = jnp.ones((1, C), jnp.float32)
    mod.bn_shift = jnp.full((1, C), 0.25, jnp.float32)
    v_star2, _ = mod(v, imgD)
    v_star2 = jax.block_until_ready(v_star2)
    with jax.default_matmul_precision("float32"):
        z2 = y_ref.reshape(-1, CI) @ mod.ww[:CI, :] + mod.bw
        v_star2_ref = (z2 * mod.bn_scale + mod.bn_shift + v.reshape(-1, C)).reshape(B0, S, N, C)
    assert jnp.allclose(v_star2, v_star2_ref, atol=5e-3, rtol=1e-2)

    print("KERNEL_OK")
</pallas_src>

<mosaic_0001>
module attributes {stable_mosaic.version = 11 : i64} {
  func.func @_linear_bias_kernel(%arg0: i32, %arg1: memref<256x128xf32, #tpu.memory_space<vmem>>, %arg2: memref<128x128xf32, #tpu.memory_space<vmem>>, %arg3: memref<1x128xf32, #tpu.memory_space<vmem>>, %arg4: memref<256x128xf32, #tpu.memory_space<vmem>>) attributes {dimension_semantics = [#tpu.dimension_semantics<parallel>], iteration_bounds = array<i64: 9>, scalar_prefetch = 0 : i64, scratch_operands = 0 : i64, tpu.core_type = #tpu.core_type<tc>, window_params = [{transform_indices = @transform_0, window_bounds = array<i64: 256, 128>}, {pipeline_mode = #tpu.pipeline_mode<synchronous>, transform_indices = @transform_1, window_bounds = array<i64: 128, 128>}, {pipeline_mode = #tpu.pipeline_mode<synchronous>, transform_indices = @transform_2, window_bounds = array<i64: 1, 128>}, {transform_indices = @transform_3, window_bounds = array<i64: 256, 128>}]} {
    %c0 = arith.constant 0 : index
    %c0_0 = arith.constant 0 : index
    %0 = vector.load %arg1[%c0, %c0_0] : memref<256x128xf32, #tpu.memory_space<vmem>>, vector<256x128xf32>
    %c0_1 = arith.constant 0 : index
    %c0_2 = arith.constant 0 : index
    %1 = vector.load %arg2[%c0_1, %c0_2] : memref<128x128xf32, #tpu.memory_space<vmem>>, vector<128x128xf32>
    %cst = arith.constant dense<0.000000e+00> : vector<256x128xf32>
    %2 = tpu.matmul %0, %1, %cst {dimension_numbers = #tpu.dot_dimension_numbers<[1], [0], [0], [1], [0, 0, 1, 1], [], []>} : vector<256x128xf32>, vector<128x128xf32>, vector<256x128xf32> -> vector<256x128xf32>
    %c0_3 = arith.constant 0 : index
    %c0_4 = arith.constant 0 : index
    %3 = vector.load %arg3[%c0_3, %c0_4] : memref<1x128xf32, #tpu.memory_space<vmem>>, vector<1x128xf32>
    %4 = vector.broadcast %3 : vector<1x128xf32> to vector<256x128xf32>
    %5 = arith.addf %2, %4 : vector<256x128xf32>
    %c0_5 = arith.constant 0 : index
    %c0_6 = arith.constant 0 : index
    %6 = vector.load %arg4[%c0_5, %c0_6] : memref<256x128xf32, #tpu.memory_space<vmem>>, vector<256x128xf32>
    tpu.vector_store %arg4[%c0_5, %c0_6], %5 {strides = array<i32>} : memref<256x128xf32, #tpu.memory_space<vmem>>, vector<256x128xf32>,
    return
  }
  func.func @transform_0(%arg0: i32) -> (i32, i32) {
    %c0_i32 = arith.constant 0 : i32
    %c0_i32_0 = arith.constant 0 : i32
    return %arg0, %c0_i32 : i32, i32
  }
  func.func @transform_1(%arg0: i32) -> (i32, i32) {
    %c0_i32 = arith.constant 0 : i32
    %c0_i32_0 = arith.constant 0 : i32
    %c0_i32_1 = arith.constant 0 : i32
    return %c0_i32, %c0_i32_0 : i32, i32
  }
  func.func @transform_2(%arg0: i32) -> (i32, i32) {
    %c0_i32 = arith.constant 0 : i32
    %c0_i32_0 = arith.constant 0 : i32
    %c0_i32_1 = arith.constant 0 : i32
    return %c0_i32, %c0_i32_0 : i32, i32
  }
  func.func @transform_3(%arg0: i32) -> (i32, i32) {
    %c0_i32 = arith.constant 0 : i32
    %c0_i32_0 = arith.constant 0 : i32
    return %arg0, %c0_i32 : i32, i32
  }
}

</mosaic_0001>

<bundles_post_ra>
// kernel: tpu_custom_call.1
= control target key start
LH: loop header
LB: loop body
LE: loop exit
PB: predicated region body
PF: predicated region fallthrough
CT: control target
= control target key end

     0   :  { %8 = vsyncpa [#allocation3], 0  ;;  %s1429_s0 = inlined_call_operand.hbm [shape: f32[2304,128], index: 0, kind: input, shape index: {}]   ;;  %s1430_s1 = inlined_call_operand.hbm [shape: f32[128,128], index: 1, kind: input, shape index: {}]   ;;  %s1431_s2 = inlined_call_operand.hbm [shape: f32[1,128], index: 2, kind: input, shape index: {}]   ;;  %s1432_s3 = inlined_call_operand.hbm [shape: f32[2304,128], index: 3, kind: output, shape index: {}]  }
   0x1   :  { %10 = vsyncpa [#allocation3 + $0x1], 0 }
   0x2   :  { %11 = vsyncpa [#allocation6], 0 }
   0x3   :  { %12 = vsyncpa [#allocation4], 0 }
   0x4   :  { %14 = vsyncpa [#allocation4 + $0x1], 0  ;;  %s1090_s12 = smov 0   ;;  %s1092_s13 = smov 0  }
   0x5   :  { %s1094_s14 = smov 0   ;;  %s1096_s15 = smov 0  }
   0x6 LB: > { %s1111_s16 = sadd.s32 4294967295, %s1060_s15   ;;  %s636_s17 = sadd.s32 4294967294, %s1060_s15   ;;  %s1060_s15 = sphi %s1096_s15, %s1451_s15   ;;  %s1056_s14 = sphi %s1094_s14, %s1450_s14   ;;  %s1052_s13 = sphi %s1092_s13, %s1449_s13   ;;  %s1048_s12 = sphi %s1090_s12, %s1448_s12  }
   0x7   : > { %p40_p0 = scmp.ne.s32.totalorder %s1052_s13, %s1048_s12  ;;  %p1433_p1 = scmp.eq.s32.totalorder %s1111_s16, 0 }
   0x8   : > { %p112_p3 = scmp.eq.s32.totalorder %s636_s17, 8  ;;  %p637_p5 = scmp.ge.s32.totalorder %s1060_s15, 1 }
   0x9   : > { %p1120_p4 = por %p1433_p1, %p40_p0  ;;  %p119_p7 = scmp.lt.s32.totalorder %s1060_s15, 10 }
   0xa   : > { %p1125_p6 = por %p112_p3, %p40_p0  ;;  %s1062_s21 = smov [#allocation5]  }
   0xb   : > { %s1436_s18 = scalar_select %p1120_p4, 1, 0 }
   0xc   : > { %s1437_s19 = scalar_select %p1125_p6, 1, 0 }
   0xd   : > { %p1130_p8 = pnand %p637_p5, %p119_p7  ;;  %s131_s22 = sshll.u32 %s1062_s21, 4  ;;  %s132_s22 = int_to_ptr.vmem [resolvable:$true] %s131_s22 }
   0xe   : > { %s1063_s24 = smov [#allocation7]   ;;  %s904_s28 = scalar_lea.hbm %s1430_s1, 2048 }
   0xf   : > { %s1438_s20 = scalar_select %p1130_p8, 1, 0 }
  0x10   : > { %p845_p9 = pneg %p1130_p8  ;;  %s145_s25 = sshll.u32 %s1063_s24, 4  ;;  %s1142_s25 = int_to_ptr.vmem [resolvable:$true] %s145_s25 }
  0x11   : > { %p905_p11 = scmp.ne.s32.totalorder %s1430_s1, %s904_s28  ;;  %p911_p3 = scmp.lt.u32.totalorder %s904_s28, %s1430_s1 }
  0x12   : > { %p1138_p10 = pnand %p845_p9, %p1433_p1 }
  0x14   : > { %p906_p12 = pneg %p1138_p10 }
  0x16   : > { %p907_p13 = pnand %p906_p12, %p905_p11 }
  0x18   : > { %p908_p0 = pneg %p907_p13 }
  0x1a   : > { %p913_p5 = pnand %p911_p3, %p908_p0 }
  0x1c   : > { %916 = shalt.err (!%p913_p5)
}
  0x1d   : > { %s917_s6 = scalar_lea.vmem %s132_s22, 2048  ;;  %p925_p2 = scmp.lt.s32.totalorder %s132_s22, %s132_s22 }
  0x1e   : > { %p918_p7 = scmp.ne.s32.totalorder %s132_s22, %s917_s6  ;;  %p926_p6 = scmp.lt.s32.totalorder %s917_s6, %s917_s6 }
  0x20   : > { %p920_p9 = pnand %p918_p7, %p906_p12  ;;  %p927_p4 = por %p926_p6, %p925_p2 }
  0x22   : > { %p921_p1 = pneg %p920_p9 }
  0x24   : > { %p928_p8 = pnand %p927_p4, %p921_p1 }
  0x26   : > { %931 = shalt.err (!%p928_p8)
}
  0x27   : > { %s1064_s7 = smov 128   ;;  %s1065_s8 = smov 8  }
  0x28   : > { %848 = dma.hbm_to_vmem [thread:$0]  (!%p1138_p10), %s1430_s1, 2048, %s132_s22, [#allocation6], %s1064_s7, %s1064_s7, %s1065_s8  }
  0x29   : > { %s932_s21 = scalar_lea.hbm %s1431_s2, 16 }
  0x2a   : > { %p933_p1 = scmp.ne.s32.totalorder %s1431_s2, %s932_s21  ;;  %p939_p6 = scmp.lt.u32.totalorder %s932_s21, %s1431_s2 }
  0x2c   : > { %p935_p2 = pnand %p933_p1, %p906_p12 }
  0x2e   : > { %p936_p4 = pneg %p935_p2 }
  0x30   : > { %p941_p8 = pnand %p939_p6, %p936_p4 }
  0x32   : > { %944 = shalt.err (!%p941_p8)
}
  0x33   : > { %s945_s22 = scalar_lea.vmem %s1142_s25, 16  ;;  %s952_s29 = scalar_lea.vmem %s1142_s25, 32 }
  0x34   : > { %p946_p11 = scmp.ne.s32.totalorder %s1142_s25, %s945_s22  ;;  %p953_p3 = scmp.lt.s32.totalorder %s1142_s25, %s1142_s25 }
  0x35   : > { %p954_p5 = scmp.lt.s32.totalorder %s952_s29, %s945_s22 }
  0x36   : > { %p948_p13 = pnand %p946_p11, %p906_p12 }
  0x37   : > { %p955_p7 = por %p954_p5, %p953_p3 }
  0x38   : > { %p949_p0 = pneg %p948_p13 }
  0x3a   : > { %p956_p9 = pnand %p955_p7, %p949_p0 }
  0x3c   : > { %959 = shalt.err (!%p956_p9)
}
  0x3d   : > { %851 = dma.hbm_to_vmem [thread:$0]  (!%p1138_p10), %s1431_s2, 16, %s1142_s25, [#allocation6]  }
  0x3e   : > { %s1196_s5 = sadd.s32 1, %s1060_s15   ;;  %s27_s23 = sadd.s32 1, %s1056_s14 }
  0x3f   : > { %s24_s6 = ssub.s32 %s1060_s15, %s1196_s5  ;;  %p34_p12 = scmp.ne.s32.totalorder %s1056_s14, %s1052_s13 }
  0x40   : > { %p25_p1 = scmp.eq.s32.totalorder %s24_s6, 0  ;;  %p35_p2 = scmp.eq.s32.totalorder %s1060_s15, 0 }
  0x41   : > { %p1440_p4 = scmp.eq.s32.totalorder %s1111_s16, 8  ;;  %p862_p8 = scmp.lt.s32.totalorder %s1060_s15, 9 }
  0x42   : > { %s1212_s10 = scalar_select %p25_p1, %s1056_s14, %s27_s23  }
  0x43   : > { %p1206_p6 = por %p1440_p4, %p34_p12  ;;  %p36_p11 = por %p35_p2, %p34_p12 }
  0x44   : > { %s156_s11 = sand.u32 1, %s1056_s14   ;;  %s655_s25 = sshll.u32 %s1060_s15, 12 }
  0x45   : > { %s641_s17 = sshll.u32 %s156_s11, 8  ;;  %s1219_s26 = scalar_lea.hbm %s1429_s0, %s655_s25 }
  0x46   : > { %s160_s27 = scalar_lea.vmem [#allocation2], %s641_s17  ;;  %p1223_p10 = pnand %p862_p8, %p36_p11 }
  0x47   : > { %s167_s28 = sshll.u32 %s160_s27, 4  ;;  %s1227_s29 = scalar_lea.sflag [#allocation3], %s156_s11  ;;  %s1221_s28 = int_to_ptr.vmem [resolvable:$true] %s167_s28 }
  0x48   : > { %s960_s30 = scalar_lea.hbm %s1219_s26, 4096  ;;  %p962_p0 = pneg %p1223_p10 }
  0x49   : > { %p961_p13 = scmp.ne.s32.totalorder %s1219_s26, %s960_s30  ;;  %s965_s6 = scalar_lea.hbm %s1429_s0, 36864 }
  0x4a   : > { %p966_p7 = scmp.lt.u32.totalorder %s1219_s26, %s1429_s0  ;;  %p967_p9 = scmp.lt.u32.totalorder %s965_s6, %s960_s30 }
  0x4b   : > { %p963_p3 = pnand %p962_p0, %p961_p13  ;;  %p969_p1 = scmp.lt.u32.totalorder %s960_s30, %s1219_s26 }
  0x4c   : > { %p968_p12 = por %p967_p9, %p966_p7 }
  0x4d   : > { %p964_p5 = pneg %p963_p3 }
  0x4e   : > { %p970_p2 = por %p969_p1, %p968_p12 }
  0x50   : > { %p971_p4 = pnand %p970_p2, %p964_p5 }
  0x52   : > { %974 = shalt.err (!%p971_p4)
}
  0x53   : > { %s975_s11 = scalar_lea.vmem %s1221_s28, 4096  ;;  %s1066_s21 = smov [#allocation2]  }
  0x54   : > { %p976_p8 = scmp.ne.s32.totalorder %s1221_s28, %s975_s11  ;;  %s980_s24 = sshll.u32 %s1066_s21, 4  ;;  %s981_s24 = int_to_ptr.vmem [resolvable:$false] %s980_s24 }
  0x55   : > { %s982_s27 = scalar_lea.vmem %s981_s24, 8192  ;;  %p983_p3 = scmp.lt.s32.totalorder %s1221_s28, %s981_s24 }
  0x56   : > { %p978_p11 = pnand %p976_p8, %p962_p0  ;;  %p984_p7 = scmp.lt.s32.totalorder %s982_s27, %s975_s11 }
  0x58   : > { %p979_p13 = pneg %p978_p11  ;;  %p985_p9 = por %p984_p7, %p983_p3 }
  0x5a   : > { %p986_p12 = pnand %p985_p9, %p979_p13 }
  0x5c   : > { %989 = shalt.err (!%p986_p12)
}
  0x5d   : > { %855 = dma.hbm_to_vmem [thread:$0]  (!%p1223_p10), %s1219_s26, 4096, %s1221_s28, %s1227_s29, %s1064_s7, %s1064_s7, %s1065_s8  }
  0x5e   : > { %p1443_p0 = scmp.ne.s32.totalorder %s1438_s20, 0 }
  0x5f   : > { %s1261_s30 = sand.u32 (!%p1443_p0), 1, %s1052_s13   ;;  %p1444_p5 = scmp.ne.s32.totalorder (!%p1443_p0), %s1436_s18, 0 }
  0x60   : > { %179 = sbr.rel (%p1443_p0) target bundleno = 400 (0x190), region = 32  ;;  %s645_s4 = sshll.u32 (!%p1443_p0), %s1261_s30, 8 }
  0x61   : > { %s182_s23 = scalar_lea.sflag (!%p1443_p0), [#allocation3], %s1261_s30  ;;  %s1267_s22 = scalar_lea.vmem (!%p1443_p0), [#allocation2], %s645_s4 }
  0x67   : > { %1035 = dma.done.wait (%p1444_p5), %s182_s23, 4096  }
  0x68   : > { %1037 = vsyncadd (%p1444_p5), %s182_s23, 4294963200  ;;  %p1445_p10 = scmp.eq.s32.totalorder %s1111_s16, 0 }
  0x6a   : > { %1039 = dma.done.wait (%p1445_p10), [#allocation6], 2064   ;;  %p1446_p1 = pmov %p1445_p10 }
  0x6b   : > { %v250_v0 = vld [vmem:[#allocation5] sm:$0xff]  ;;  %v251_v1 = vld [vmem:[#allocation5 + $0x8] sm:$0xff]  ;;  %v252_v2 = vld [vmem:[#allocation5 + $0x10] sm:$0xff]  ;;  %s1317_s18 = scalar_lea.vmem [#allocation8], %s645_s4  ;;  %s656_s20 = sshll.u32 %s1111_s16, 12 }
  0x6c   : > { %1041 = vsyncadd (%p1446_p1), [#allocation6], 4294965232  ;;  %v785_v3 = vpack.c.bf16 %v251_v1, %v250_v0  ;;  %v253_v4 = vld [vmem:[#allocation5 + $0x18] sm:$0xff]  ;;  %v254_v6 = vld [vmem:[#allocation5 + $0x20] sm:$0xff]  ;;  %s544_s7 = sshll.u32 %s1317_s18, 4  ;;  %s1378_s26 = scalar_lea.hbm %s1432_s3, %s656_s20  ;;  %s1380_s7 = int_to_ptr.vmem [resolvable:$true] %s544_s7 }
  0x6d   : > { %v789_v5 = vpack.c.bf16 %v253_v4, %v252_v2  ;;  %v255_v7 = vld [vmem:[#allocation5 + $0x28] sm:$0xff]  ;;  %v218_v9 = vld [vmem:[%s1267_s22] sm:$0xff]  ;;  %v256_v11 = vld [vmem:[#allocation5 + $0x30] sm:$0xff]  ;;  %s531_s28 = scalar_lea.sflag [#allocation4], %s1261_s30  ;;  %s990_s29 = scalar_lea.vmem %s1380_s7, 4096 }
  0x6e   : > { %786 = vmatprep.subr.bf16.mxu0 %v785_v3  ;;  %817 = vmatprep.subr.bf16.mxu1 %v785_v3  ;;  %v793_v8 = vpack.c.bf16 %v255_v7, %v254_v6  ;;  %v234_v10 = vld [vmem:[%s1267_s22 + $0x80] sm:$0xff]  ;;  %v257_v12 = vld [vmem:[#allocation5 + $0x38] sm:$0xff]  ;;  %v259_v15 = vld [vmem:[#allocation5 + $0x48] sm:$0xff]  ;;  %p991_p2 = scmp.ne.s32.totalorder %s1380_s7, %s990_s29  ;;  %s1067_s6 = smov [#allocation8]  }
  0x6f   : > { %788 = vmatpush3.bf16.msra.mxu0 %v785_v3  ;;  %825 = vmatpush3.bf16.msra.mxu1 %v785_v3  ;;  %v797_v13 = vpack.c.bf16 %v257_v12, %v256_v11  ;;  %v258_v14 = vld [vmem:[#allocation5 + $0x40] sm:$0xff]  ;;  %v260_v17 = vld [vmem:[#allocation5 + $0x50] sm:$0xff]  ;;  %v261_v18 = vld [vmem:[#allocation5 + $0x58] sm:$0xff]  ;;  %s994_s17 = sshll.u32 %s1067_s6, 4  ;;  %s995_s17 = int_to_ptr.vmem [resolvable:$false] %s994_s17 }
  0x70   : > { %790 = vmatprep.subr.bf16.mxu0 %v789_v5  ;;  %818 = vmatprep.subr.bf16.mxu1 %v789_v5  ;;  %v801_v16 = vpack.c.bf16 %v259_v15, %v258_v14  ;;  %v805_v19 = vpack.c.bf16 %v261_v18, %v260_v17  ;;  %v262_v20 = vld [vmem:[#allocation5 + $0x60] sm:$0xff]  ;;  %v263_v21 = vld [vmem:[#allocation5 + $0x68] sm:$0xff]  ;;  %v264_v23 = vld [vmem:[#allocation5 + $0x70] sm:$0xff]  ;;  %p992_p4 = pnand %p991_p2, %p1206_p6  ;;  %s996_s25 = scalar_lea.vmem %s995_s17, 8192 }
  0x71   : > { %737 = vmatprep.mubr.f32.mxu0 %v218_v9  ;;  %761 = vmatprep.mubr.f32.mxu1 %v234_v10  ;;  %v809_v22 = vpack.c.bf16 %v263_v21, %v262_v20  ;;  %v265_v24 = vld [vmem:[#allocation5 + $0x78] sm:$0xff]  ;;  %v219_v26 = vld [vmem:[%s1267_s22 + $0x8] sm:$0xff]  ;;  %v220_v28 = vld [vmem:[%s1267_s22 + $0x10] sm:$0xff]  ;;  %p997_p11 = scmp.lt.s32.totalorder %s1380_s7, %s995_s17  ;;  %p998_p13 = scmp.lt.s32.totalorder %s996_s25, %s990_s29 }
  0x72   : > { %v813_v25 = vpack.c.bf16 %v265_v24, %v264_v23  ;;  %v235_v27 = vld [vmem:[%s1267_s22 + $0x88] sm:$0xff]  ;;  %v236_v29 = vld [vmem:[%s1267_s22 + $0x90] sm:$0xff]  ;;  %v221_v30 = vld [vmem:[%s1267_s22 + $0x18] sm:$0xff]  ;;  %p993_p8 = pneg %p992_p4 }
  0x73   : > { %792 = vmatpush3.bf16.msra.mxu0 %v789_v5  ;;  %826 = vmatpush3.bf16.msra.mxu1 %v789_v5  ;;  %v237_v31 = vld [vmem:[%s1267_s22 + $0x98] sm:$0xff]  ;;  %v222_v32 = vld [vmem:[%s1267_s22 + $0x20] sm:$0xff]  ;;  %v223_v34 = vld [vmem:[%s1267_s22 + $0x28] sm:$0xff]  ;;  %p999_p3 = por %p998_p13, %p997_p11 }
  0x74   : > { %794 = vmatprep.subr.bf16.mxu0 %v793_v8  ;;  %819 = vmatprep.subr.bf16.mxu1 %v793_v8  ;;  %v238_v33 = vld [vmem:[%s1267_s22 + $0xa0] sm:$0xff]  ;;  %v239_v35 = vld [vmem:[%s1267_s22 + $0xa8] sm:$0xff]  ;;  %v224_v36 = vld [vmem:[%s1267_s22 + $0x30] sm:$0xff] }
  0x75   : > { %v240_v37 = vld [vmem:[%s1267_s22 + $0xb0] sm:$0xff]  ;;  %v225_v38 = vld [vmem:[%s1267_s22 + $0x38] sm:$0xff]  ;;  %v226_v40 = vld [vmem:[%s1267_s22 + $0x40] sm:$0xff]  ;;  %p1000_p7 = pnand %p999_p3, %p993_p8 }
  0x76   : > { %v241_v39 = vld [vmem:[%s1267_s22 + $0xb8] sm:$0xff]  ;;  %v242_v41 = vld [vmem:[%s1267_s22 + $0xc0] sm:$0xff]  ;;  %v227_v42 = vld [vmem:[%s1267_s22 + $0x48] sm:$0xff] }
  0x77   : > { %796 = vmatpush3.bf16.msra.mxu0 %v793_v8  ;;  %827 = vmatpush3.bf16.msra.mxu1 %v793_v8  ;;  %v243_v43 = vld [vmem:[%s1267_s22 + $0xc8] sm:$0xff]  ;;  %v228_v44 = vld [vmem:[%s1267_s22 + $0x50] sm:$0xff]  ;;  %v229_v46 = vld [vmem:[%s1267_s22 + $0x58] sm:$0xff] }
  0x78   : > { %798 = vmatprep.subr.bf16.mxu0 %v797_v13  ;;  %820 = vmatprep.subr.bf16.mxu1 %v797_v13  ;;  %v244_v45 = vld [vmem:[%s1267_s22 + $0xd0] sm:$0xff]  ;;  %v245_v47 = vld [vmem:[%s1267_s22 + $0xd8] sm:$0xff]  ;;  %v230_v48 = vld [vmem:[%s1267_s22 + $0x60] sm:$0xff] }
  0x79   : > { %v246_v49 = vld [vmem:[%s1267_s22 + $0xe0] sm:$0xff]  ;;  %v231_v50 = vld [vmem:[%s1267_s22 + $0x68] sm:$0xff]  ;;  %v232_v52 = vld [vmem:[%s1267_s22 + $0x70] sm:$0xff] }
  0x7a   : > { %v247_v51 = vld [vmem:[%s1267_s22 + $0xe8] sm:$0xff]  ;;  %v248_v53 = vld [vmem:[%s1267_s22 + $0xf0] sm:$0xff]  ;;  %v233_v54 = vld [vmem:[%s1267_s22 + $0x78] sm:$0xff] }
  0x7b   : > { %800 = vmatpush3.bf16.msra.mxu0 %v797_v13  ;;  %828 = vmatpush3.bf16.msra.mxu1 %v797_v13  ;;  %v249_v55 = vld [vmem:[%s1267_s22 + $0xf8] sm:$0xff]  ;;  %v1309_v56 = vld [vmem:[#allocation7] ss:$0 sm:$0xff] }
  0x7c   : > { %802 = vmatprep.subr.bf16.mxu0 %v801_v16  ;;  %821 = vmatprep.subr.bf16.mxu1 %v801_v16 }
  0x7f   : > { %804 = vmatpush3.bf16.msra.mxu0 %v801_v16  ;;  %829 = vmatpush3.bf16.msra.mxu1 %v801_v16 }
  0x80   : > { %806 = vmatprep.subr.bf16.mxu0 %v805_v19  ;;  %822 = vmatprep.subr.bf16.mxu1 %v805_v19 }
  0x83   : > { %808 = vmatpush3.bf16.msra.mxu0 %v805_v19  ;;  %830 = vmatpush3.bf16.msra.mxu1 %v805_v19 }
  0x84   : > { %810 = vmatprep.subr.bf16.mxu0 %v809_v22  ;;  %823 = vmatprep.subr.bf16.mxu1 %v809_v22 }
  0x87   : > { %812 = vmatpush3.bf16.msra.mxu0 %v809_v22  ;;  %831 = vmatpush3.bf16.msra.mxu1 %v809_v22 }
  0x88   : > { %814 = vmatprep.subr.bf16.mxu0 %v813_v25  ;;  %824 = vmatprep.subr.bf16.mxu1 %v813_v25 }
  0x8b   : > { %816 = vmatpush3.bf16.msra.mxu0 %v813_v25  ;;  %832 = vmatpush3.bf16.msra.mxu1 %v813_v25 }
  0x8e   : > { %738 = vmatmul.mubr.f32.vlgmr.msra.gmra.mrb[0].mxu0 %v219_v26  ;;  %762 = vmatmul.mubr.f32.vlgmr.msra.gmra.mrb[0].mxu1 %v235_v27 }
  0x8f   : > { %740 = vmatprep.mubr.f32.mxu0 %v220_v28  ;;  %764 = vmatprep.mubr.f32.mxu1 %v236_v29 }
  0x92   : > { %741 = vmatmul.mubr.f32.gmra.mrb[2].mxu0 %v221_v30  ;;  %765 = vmatmul.mubr.f32.gmra.mrb[2].mxu1 %v237_v31 }
  0x93   : > { %743 = vmatprep.mubr.f32.mxu0 %v222_v32  ;;  %767 = vmatprep.mubr.f32.mxu1 %v238_v33 }
  0x96   : > { %744 = vmatmul.mubr.f32.gmra.mrb[4].mxu0 %v223_v34  ;;  %768 = vmatmul.mubr.f32.gmra.mrb[4].mxu1 %v239_v35 }
  0x97   : > { %746 = vmatprep.mubr.f32.mxu0 %v224_v36  ;;  %770 = vmatprep.mubr.f32.mxu1 %v240_v37 }
  0x9a   : > { %747 = vmatmul.mubr.f32.gmra.mrb[6].mxu0 %v225_v38  ;;  %771 = vmatmul.mubr.f32.gmra.mrb[6].mxu1 %v241_v39 }
  0x9b   : > { %749 = vmatprep.mubr.f32.mxu0 %v226_v40  ;;  %773 = vmatprep.mubr.f32.mxu1 %v242_v41 }
  0x9e   : > { %750 = vmatmul.mubr.f32.gmra.mrb[8].mxu0 %v227_v42  ;;  %774 = vmatmul.mubr.f32.gmra.mrb[8].mxu1 %v243_v43 }
  0x9f   : > { %752 = vmatprep.mubr.f32.mxu0 %v228_v44  ;;  %776 = vmatprep.mubr.f32.mxu1 %v244_v45 }
  0xa2   : > { %753 = vmatmul.mubr.f32.gmra.mrb[10].mxu0 %v229_v46  ;;  %777 = vmatmul.mubr.f32.gmra.mrb[10].mxu1 %v245_v47 }
  0xa3   : > { %755 = vmatprep.mubr.f32.mxu0 %v230_v48  ;;  %779 = vmatprep.mubr.f32.mxu1 %v246_v49 }
  0xa6   : > { %756 = vmatmul.mubr.f32.gmra.mrb[12].mxu0 %v231_v50  ;;  %780 = vmatmul.mubr.f32.gmra.mrb[12].mxu1 %v247_v51 }
  0xa7   : > { %758 = vmatprep.mubr.f32.mxu0 %v232_v52  ;;  %782 = vmatprep.mubr.f32.mxu1 %v248_v53 }
  0xaa   : > { %759 = vmatmul.mubr.f32.gmra.mrb[14].mxu0 %v233_v54  ;;  %783 = vmatmul.mubr.f32.gmra.mrb[14].mxu1 %v249_v55 }
 0x161   : > { %v739_v57 = vpop.f32.mrb[0].mxu0  ;;  %v763_v58 = vpop.f32.mrb[0].mxu1 }
 0x162   : > { %v345_v59 = vadd.f32 %v739_v57, %v1309_v56  ;;  %v425_v60 = vadd.f32 %v763_v58, %v1309_v56  ;;  %v339_v61 = vpop.f32.mrb[1].mxu0  ;;  %v419_v62 = vpop.f32.mrb[1].mxu1 }
 0x163   : > { %v340_v63 = vadd.f32 %v1309_v56, %v339_v61  ;;  %v420_v0 = vadd.f32 %v1309_v56, %v419_v62 }
 0x164   : > { %499 = vst [vmem:[%s1317_s18 + $0x8] sm:$0xff] %v345_v59  ;;  %515 = vst [vmem:[%s1317_s18 + $0x88] sm:$0xff] %v425_v60 }
 0x165   : > { %498 = vst [vmem:[%s1317_s18] sm:$0xff] %v340_v63  ;;  %514 = vst [vmem:[%s1317_s18 + $0x80] sm:$0xff] %v420_v0  ;;  %v742_v1 = vpop.f32.mrb[2].mxu0  ;;  %v766_v2 = vpop.f32.mrb[2].mxu1 }
 0x166   : > { %v355_v3 = vadd.f32 %v742_v1, %v1309_v56  ;;  %v435_v4 = vadd.f32 %v766_v2, %v1309_v56  ;;  %v349_v5 = vpop.f32.mrb[3].mxu0  ;;  %v429_v6 = vpop.f32.mrb[3].mxu1 }
 0x167   : > { %v350_v7 = vadd.f32 %v1309_v56, %v349_v5  ;;  %v430_v8 = vadd.f32 %v1309_v56, %v429_v6 }
 0x168   : > { %501 = vst [vmem:[%s1317_s18 + $0x18] sm:$0xff] %v355_v3  ;;  %517 = vst [vmem:[%s1317_s18 + $0x98] sm:$0xff] %v435_v4 }
 0x169   : > { %500 = vst [vmem:[%s1317_s18 + $0x10] sm:$0xff] %v350_v7  ;;  %516 = vst [vmem:[%s1317_s18 + $0x90] sm:$0xff] %v430_v8  ;;  %v745_v9 = vpop.f32.mrb[4].mxu0  ;;  %v769_v10 = vpop.f32.mrb[4].mxu1 }
 0x16a   : > { %v365_v11 = vadd.f32 %v745_v9, %v1309_v56  ;;  %v445_v12 = vadd.f32 %v769_v10, %v1309_v56  ;;  %v359_v13 = vpop.f32.mrb[5].mxu0  ;;  %v439_v14 = vpop.f32.mrb[5].mxu1 }
 0x16b   : > { %v360_v15 = vadd.f32 %v1309_v56, %v359_v13  ;;  %v440_v16 = vadd.f32 %v1309_v56, %v439_v14 }
 0x16c   : > { %503 = vst [vmem:[%s1317_s18 + $0x28] sm:$0xff] %v365_v11  ;;  %519 = vst [vmem:[%s1317_s18 + $0xa8] sm:$0xff] %v445_v12 }
 0x16d   : > { %502 = vst [vmem:[%s1317_s18 + $0x20] sm:$0xff] %v360_v15  ;;  %518 = vst [vmem:[%s1317_s18 + $0xa0] sm:$0xff] %v440_v16  ;;  %v748_v17 = vpop.f32.mrb[6].mxu0  ;;  %v772_v18 = vpop.f32.mrb[6].mxu1 }
 0x16e   : > { %v375_v19 = vadd.f32 %v748_v17, %v1309_v56  ;;  %v455_v20 = vadd.f32 %v772_v18, %v1309_v56  ;;  %v369_v21 = vpop.f32.mrb[7].mxu0  ;;  %v449_v22 = vpop.f32.mrb[7].mxu1 }
 0x16f   : > { %v370_v23 = vadd.f32 %v1309_v56, %v369_v21  ;;  %v450_v24 = vadd.f32 %v1309_v56, %v449_v22 }
 0x170   : > { %505 = vst [vmem:[%s1317_s18 + $0x38] sm:$0xff] %v375_v19  ;;  %521 = vst [vmem:[%s1317_s18 + $0xb8] sm:$0xff] %v455_v20 }
 0x171   : > { %504 = vst [vmem:[%s1317_s18 + $0x30] sm:$0xff] %v370_v23  ;;  %520 = vst [vmem:[%s1317_s18 + $0xb0] sm:$0xff] %v450_v24  ;;  %v751_v25 = vpop.f32.mrb[8].mxu0  ;;  %v775_v26 = vpop.f32.mrb[8].mxu1 }
 0x172   : > { %v385_v27 = vadd.f32 %v751_v25, %v1309_v56  ;;  %v465_v28 = vadd.f32 %v775_v26, %v1309_v56  ;;  %v379_v29 = vpop.f32.mrb[9].mxu0  ;;  %v459_v30 = vpop.f32.mrb[9].mxu1 }
 0x173   : > { %v380_v31 = vadd.f32 %v1309_v56, %v379_v29  ;;  %v460_v32 = vadd.f32 %v1309_v56, %v459_v30 }
 0x174   : > { %507 = vst [vmem:[%s1317_s18 + $0x48] sm:$0xff] %v385_v27  ;;  %523 = vst [vmem:[%s1317_s18 + $0xc8] sm:$0xff] %v465_v28 }
 0x175   : > { %506 = vst [vmem:[%s1317_s18 + $0x40] sm:$0xff] %v380_v31  ;;  %522 = vst [vmem:[%s1317_s18 + $0xc0] sm:$0xff] %v460_v32  ;;  %v754_v33 = vpop.f32.mrb[10].mxu0  ;;  %v778_v34 = vpop.f32.mrb[10].mxu1 }
 0x176   : > { %v395_v35 = vadd.f32 %v754_v33, %v1309_v56  ;;  %v475_v36 = vadd.f32 %v778_v34, %v1309_v56  ;;  %v389_v37 = vpop.f32.mrb[11].mxu0  ;;  %v469_v38 = vpop.f32.mrb[11].mxu1 }
 0x177   : > { %v390_v39 = vadd.f32 %v1309_v56, %v389_v37  ;;  %v470_v40 = vadd.f32 %v1309_v56, %v469_v38 }
 0x178   : > { %509 = vst [vmem:[%s1317_s18 + $0x58] sm:$0xff] %v395_v35  ;;  %525 = vst [vmem:[%s1317_s18 + $0xd8] sm:$0xff] %v475_v36 }
 0x179   : > { %508 = vst [vmem:[%s1317_s18 + $0x50] sm:$0xff] %v390_v39  ;;  %524 = vst [vmem:[%s1317_s18 + $0xd0] sm:$0xff] %v470_v40  ;;  %v757_v41 = vpop.f32.mrb[12].mxu0  ;;  %v781_v42 = vpop.f32.mrb[12].mxu1 }
 0x17a   : > { %v405_v43 = vadd.f32 %v757_v41, %v1309_v56  ;;  %v485_v44 = vadd.f32 %v781_v42, %v1309_v56  ;;  %v399_v45 = vpop.f32.mrb[13].mxu0  ;;  %v479_v46 = vpop.f32.mrb[13].mxu1 }
 0x17b   : > { %v400_v47 = vadd.f32 %v1309_v56, %v399_v45  ;;  %v480_v48 = vadd.f32 %v1309_v56, %v479_v46 }
 0x17c   : > { %511 = vst [vmem:[%s1317_s18 + $0x68] sm:$0xff] %v405_v43  ;;  %527 = vst [vmem:[%s1317_s18 + $0xe8] sm:$0xff] %v485_v44 }
 0x17d   : > { %510 = vst [vmem:[%s1317_s18 + $0x60] sm:$0xff] %v400_v47  ;;  %526 = vst [vmem:[%s1317_s18 + $0xe0] sm:$0xff] %v480_v48  ;;  %v760_v49 = vpop.f32.mrb[14].mxu0  ;;  %v784_v50 = vpop.f32.mrb[14].mxu1 }
 0x17e   : > { %v415_v51 = vadd.f32 %v760_v49, %v1309_v56  ;;  %v495_v52 = vadd.f32 %v784_v50, %v1309_v56  ;;  %v409_v53 = vpop.f32.mrb[15].mxu0  ;;  %v489_v54 = vpop.f32.mrb[15].mxu1 }
 0x17f   : > { %v410_v55 = vadd.f32 %v1309_v56, %v409_v53  ;;  %v490_v57 = vadd.f32 %v1309_v56, %v489_v54 }
 0x180   : > { %513 = vst [vmem:[%s1317_s18 + $0x78] sm:$0xff] %v415_v51  ;;  %529 = vst [vmem:[%s1317_s18 + $0xf8] sm:$0xff] %v495_v52 }
 0x181   : > { %512 = vst [vmem:[%s1317_s18 + $0x70] sm:$0xff] %v410_v55  ;;  %528 = vst [vmem:[%s1317_s18 + $0xf0] sm:$0xff] %v490_v57 }
 0x182   : > { %1003 = shalt.err (!%p1000_p7)
}
 0x183   : > { %s1004_s11 = scalar_lea.hbm %s1378_s26, 4096  ;;  %s1008_s27 = scalar_lea.hbm %s1432_s3, 36864 }
 0x184   : > { %p1005_p9 = scmp.ne.s32.totalorder %s1378_s26, %s1004_s11  ;;  %p1009_p5 = scmp.lt.u32.totalorder %s1378_s26, %s1432_s3 }
 0x185   : > { %p1010_p10 = scmp.lt.u32.totalorder %s1008_s27, %s1004_s11  ;;  %p1012_p2 = scmp.lt.u32.totalorder %s1004_s11, %s1378_s26 }
 0x186   : > { %p1006_p12 = pnand %p1005_p9, %p1206_p6 }
 0x187   : > { %p1011_p1 = por %p1010_p10, %p1009_p5 }
 0x188   : > { %p1007_p0 = pneg %p1006_p12 }
 0x189   : > { %p1013_p4 = por %p1012_p2, %p1011_p1 }
 0x18b   : > { %p1014_p8 = pnand %p1013_p4, %p1007_p0 }
 0x18d   : > { %1017 = shalt.err (!%p1014_p8)
}
 0x18e   : > { %s1068_s22 = smov 128   ;;  %s1069_s18 = smov 8  }
 0x18f   : > { %843 = dma.vmem_to_hbm [thread:$0]  (%p1206_p6), %s1380_s7, 4096, %s1378_s26, %s531_s28, %s1068_s22, %s1068_s22, %s1069_s18  }
 0x190 PF: > { %p865_p11 = scmp.ge.s32.totalorder %s1060_s15, 2  ;;  %s559_s20 = sand.u32 1, %s1048_s12  }
 0x191   : > { %p1447_p13 = scmp.ne.s32.totalorder %s1437_s19, 0  ;;  %s560_s16 = scalar_lea.sflag [#allocation4], %s559_s20 }
 0x193   : > { %p857_p3 = pnand %p865_p11, %p1447_p13 }
 0x195   : > { %1043 = dma.done.wait (!%p857_p3), %s560_s16, 4096  }
 0x196   : > { %1045 = vsyncadd (!%p857_p3), %s560_s16, 4294963200  ;;  %p17_p7 = scmp.ge.s32.totalorder %s1196_s5, 11   ;;  %s1448_s12 = smov %s1052_s13 }
 0x197   : > { %s1449_s13 = smov %s1056_s14  ;;  %s1450_s14 = smov %s1212_s10 }
 0x198   : > { %s1451_s15 = smov %s1196_s5  ;;  %19 = sbr.rel (!%p17_p7) target bundleno = 6 (0x6), region = 85 }
 0x19f   :  { %565 = vsyncpa [#allocation3], 1 }
 0x1a0   :  { %567 = vsyncpa [#allocation3 + $0x1], 1 }
 0x1a1   :  { %568 = vsyncpa [#allocation6], 1 }
 0x1a2   :  { %569 = vsyncpa [#allocation4], 1 }
 0x1a3   :  { %571 = vsyncpa [#allocation4 + $0x1], 1 }

</bundles_post_ra>
